<compile_context>
chip_gen: v5e
topology: v5e:2x2
jax: 0.10.0
libtpu: 0.0.40
codegen_flags: <defaults>
</compile_context>

<pallas_src>
import jax
import jax.numpy as jnp
from jax.experimental import pallas as pl
from jax.experimental.pallas import tpu as pltpu


LANE = 128          # lane-dense padding for feature / output dims
SUB_BF16 = 16       # bf16 sublane tile (padding target for the tiny hidden dim)


def _round_up(x, m):
    return (x + m - 1) // m * m


def _devise_kernel(patch_ref, pool_ref, wconv_ref, bconv_ref,
                   w1_ref, b1_ref, w2_ref, b2_ref, out_ref):
    """Per image-block fused forward:
       one consolidated K=9C conv matmul + bias + ReLU
       -> global average pool (bf16 MXU dot with block-diagonal 1/(H*W) matrix)
       -> linear (feat -> feat//4) -> ReLU -> linear (-> output_dimension)."""
    b, hw, kc = patch_ref.shape
    # ---- 3x3 "same" conv: single MXU matmul over K = 9*C (bf16, f32 acc) ----
    patches = patch_ref[...].reshape(b * hw, kc)                 # bf16, free reshape
    conv = jnp.dot(patches, wconv_ref[...],
                   preferred_element_type=jnp.float32)           # (b*hw, Fp) f32
    conv = jnp.maximum(conv + bconv_ref[...], 0.0)               # bias + ReLU (f32)

    # ---- global average pool: one bf16 MXU dot, f32 accumulation ----
    feats = jnp.dot(pool_ref[...], conv.astype(jnp.bfloat16),
                    preferred_element_type=jnp.float32)          # (b, Fp)

    # ---- replaced base_model.linear (feat -> feat//4), then self.relu_1 ----
    hid = jnp.dot(feats.astype(jnp.bfloat16), w1_ref[...],
                  preferred_element_type=jnp.float32) + b1_ref[...]
    hid = jnp.maximum(hid, 0.0)

    # ---- self.linear (feat//4 -> output_dimension) ----
    out = jnp.dot(hid.astype(jnp.bfloat16), w2_ref[...],
                  preferred_element_type=jnp.float32) + b2_ref[...]

    out_ref[...] = out.astype(out_ref.dtype)                     # lane-dense (b, 128)


def enhanced_devise_cnn(x, params):
    """x: (N, C, H, W) float32.  Returns (N, output_dimension) float32."""
    n, c, h, w = x.shape
    hw = h * w
    kc = 9 * c

    feat = params["wconv"].shape[-1]
    b1_dim = params["w1"].shape[1]
    out_dim = params["w2"].shape[1]
    fp = _round_up(feat, LANE)
    b1p = _round_up(b1_dim, SUB_BF16)        # only pad hidden K-dim to 16, not 128
    outp = _round_up(out_dim, LANE)

    # Images per grid step: amortize per-step overhead, but keep >= 2 grid steps
    # so v7x's second TensorCore is not idle.
    b_img = max(1, min(8, n // 2))
    n_blocks = -(-n // b_img)
    n_pad = n_blocks * b_img

    # ---- glue (plain JAX): im2col + lane padding; bf16 operands, f32 biases ----
    xpad = jnp.pad(x, ((0, 0), (0, 0), (1, 1), (1, 1)))            # (N,C,H+2,W+2)
    taps = [xpad[:, :, ki:ki + h, kj:kj + w]
            for ki in range(3) for kj in range(3)]                 # 9 x (N,C,H,W)
    patches = jnp.stack(taps, axis=1)                              # (N,9,C,H,W)
    patches = jnp.transpose(patches, (0, 3, 4, 1, 2)).reshape(n, hw, kc)
    patches = jnp.pad(patches, ((0, n_pad - n), (0, 0), (0, 0)))
    patches = patches.astype(jnp.bfloat16)                         # ~2*hw*kc B/img

    # Block-diagonal pooling matrix: row j has 1/(H*W) over image j's rows.
    pool = jnp.repeat(jnp.eye(b_img, dtype=jnp.float32), hw, axis=1) * (1.0 / hw)
    pool = pool.astype(jnp.bfloat16)                               # (B, B*hw)

    wconv_p = jnp.pad(params["wconv"].reshape(kc, feat),
                      ((0, 0), (0, fp - feat))).astype(jnp.bfloat16)
    bconv_p = jnp.pad(params["bconv"], (0, fp - feat)).reshape(1, fp).astype(jnp.float32)
    w1_p = jnp.pad(params["w1"], ((0, fp - feat), (0, b1p - b1_dim))).astype(jnp.bfloat16)
    b1_p = jnp.pad(params["b1"], (0, b1p - b1_dim)).reshape(1, b1p).astype(jnp.float32)
    w2_p = jnp.pad(params["w2"], ((0, b1p - b1_dim), (0, outp - out_dim))).astype(jnp.bfloat16)
    b2_p = jnp.pad(params["b2"], (0, outp - out_dim)).reshape(1, outp).astype(jnp.float32)

    weights_bytes = (pool.size * 2 + wconv_p.size * 2 + bconv_p.size * 4
                     + w1_p.size * 2 + b1_p.size * 4 + w2_p.size * 2 + b2_p.size * 4)
    step_bytes = (2 * b_img * hw * kc * 2          # double-buffered patch block
                  + 2 * b_img * outp * 4           # double-buffered output block
                  + 3 * b_img * hw * fp * 4        # conv f32 tile + bf16 copy + slack
                  + weights_bytes)
    vmem_limit = int(min(32 * 1024 * 1024, max(4 * 1024 * 1024, 2 * step_bytes)))

    flops = n_pad * (2 * hw * kc * fp              # consolidated conv matmul
                     + 3 * hw * fp                 # bias + ReLU
                     + 2 * hw * fp                 # pooling dot
                     + 2 * fp * b1p + 2 * b1p * outp)
    bytes_accessed = patches.size * 2 + weights_bytes + n_pad * outp * 4

    out_padded = pl.pallas_call(
        _devise_kernel,
        out_shape=jax.ShapeDtypeStruct((n_blocks, b_img, outp), jnp.float32),
        grid=(n_blocks,),
        in_specs=[
            # per-step image block of im2col patches (pipelined / double-buffered)
            pl.BlockSpec((b_img, hw, kc), lambda i: (i, 0, 0)),
            # small resident operands (same block every step -> fetched once)
            pl.BlockSpec((b_img, b_img * hw), lambda i: (0, 0)),
            pl.BlockSpec((kc, fp), lambda i: (0, 0)),
            pl.BlockSpec((1, fp), lambda i: (0, 0)),
            pl.BlockSpec((fp, b1p), lambda i: (0, 0)),
            pl.BlockSpec((1, b1p), lambda i: (0, 0)),
            pl.BlockSpec((b1p, outp), lambda i: (0, 0)),
            pl.BlockSpec((1, outp), lambda i: (0, 0)),
        ],
        out_specs=pl.BlockSpec((None, b_img, outp), lambda i: (i, 0, 0)),
        compiler_params=pltpu.CompilerParams(
            dimension_semantics=("parallel",),     # shard image blocks over TCs
            vmem_limit_bytes=vmem_limit),
        cost_estimate=pl.CostEstimate(
            flops=int(flops), transcendentals=0,
            bytes_accessed=int(bytes_accessed)),
    )(patches, pool, wconv_p, bconv_p, w1_p, b1_p, w2_p, b2_p)

    # TODO(synk): for large H*W or C, replace the wrapper im2col with in-kernel
    # shifted-window slicing plus a row-tiled inner grid axis so the patch block
    # and (rows, Fp) conv tile stay within the v7x 64 MiB VMEM budget.
    return out_padded.reshape(n_pad, outp)[:n, :out_dim]


def _init_params(key, c_in, feat, out_dim):
    """Deterministic PyTorch-ish uniform(-1/sqrt(fan_in), 1/sqrt(fan_in)) init."""
    keys = jax.random.split(key, 6)

    def uni(k, shape, fan_in):
        bound = 1.0 / jnp.sqrt(jnp.float32(fan_in))
        return jax.random.uniform(k, shape, jnp.float32, -bound, bound)

    base_out = feat // 4                               # in_features // 4
    return {
        # 3x3 conv, HWIO layout (kh, kw, C_in, F)
        "wconv": uni(keys[0], (3, 3, c_in, feat), c_in * 9),
        "bconv": uni(keys[1], (feat,), c_in * 9),
        # replaced base_model.linear: feat -> feat // 4
        "w1": uni(keys[2], (feat, base_out), feat),
        "b1": uni(keys[3], (base_out,), feat),
        # self.linear: feat // 4 -> output_dimension
        "w2": uni(keys[4], (base_out, out_dim), base_out),
        "b2": uni(keys[5], (out_dim,), base_out),
    }


def _reference(x, params):
    """Pure-JAX (f32) reference of the same forward, via lax.conv."""
    conv = jax.lax.conv_general_dilated(
        x, params["wconv"], window_strides=(1, 1), padding=((1, 1), (1, 1)),
        dimension_numbers=("NCHW", "HWIO", "NCHW"))
    conv = jnp.maximum(conv + params["bconv"][None, :, None, None], 0.0)
    feats = jnp.mean(conv, axis=(2, 3))                           # global avg pool
    hid = jnp.maximum(feats @ params["w1"] + params["b1"], 0.0)   # base.linear + relu_1
    return hid @ params["w2"] + params["b2"]                      # self.linear


if __name__ == "__main__":
    key = jax.random.PRNGKey(0)
    k_x, k_p = jax.random.split(key)

    N, C, H, W = 2, 4, 16, 16        # NCHW, like PyTorch
    FEAT = 32                        # base_linear_in_features (pooled conv channels)
    OUT_DIM = 32                     # output_dimension

    x = jax.random.normal(k_x, (N, C, H, W), jnp.float32)
    params = _init_params(k_p, C, FEAT, OUT_DIM)

    out = jax.jit(enhanced_devise_cnn)(x, params)
    out = jax.block_until_ready(out)

    ref = _reference(x, params)
    assert out.shape == (N, OUT_DIM)
    max_err = float(jnp.max(jnp.abs(out - ref)))
    assert jnp.allclose(out, ref, atol=2e-2, rtol=2e-2), (
        f"mismatch vs JAX reference (max abs err {max_err})")

    print("KERNEL_OK")
</pallas_src>

<mosaic_0001>
module attributes {stable_mosaic.version = 11 : i64} {
  func.func @_devise_kernel(%arg0: i32, %arg1: memref<1x256x36xbf16, #tpu.memory_space<vmem>>, %arg2: memref<1x256xbf16, #tpu.memory_space<vmem>>, %arg3: memref<36x128xbf16, #tpu.memory_space<vmem>>, %arg4: memref<1x128xf32, #tpu.memory_space<vmem>>, %arg5: memref<128x16xbf16, #tpu.memory_space<vmem>>, %arg6: memref<1x16xf32, #tpu.memory_space<vmem>>, %arg7: memref<16x128xbf16, #tpu.memory_space<vmem>>, %arg8: memref<1x128xf32, #tpu.memory_space<vmem>>, %arg9: memref<1x1x128xf32, #tpu.memory_space<vmem>>) attributes {dimension_semantics = [#tpu.dimension_semantics<parallel>], iteration_bounds = array<i64: 2>, scalar_prefetch = 0 : i64, scratch_operands = 0 : i64, tpu.core_type = #tpu.core_type<tc>, window_params = [{transform_indices = @transform_0, window_bounds = array<i64: 1, 256, 36>}, {pipeline_mode = #tpu.pipeline_mode<synchronous>, transform_indices = @transform_1, window_bounds = array<i64: 1, 256>}, {pipeline_mode = #tpu.pipeline_mode<synchronous>, transform_indices = @transform_2, window_bounds = array<i64: 36, 128>}, {pipeline_mode = #tpu.pipeline_mode<synchronous>, transform_indices = @transform_3, window_bounds = array<i64: 1, 128>}, {pipeline_mode = #tpu.pipeline_mode<synchronous>, transform_indices = @transform_4, window_bounds = array<i64: 128, 16>}, {pipeline_mode = #tpu.pipeline_mode<synchronous>, transform_indices = @transform_5, window_bounds = array<i64: 1, 16>}, {pipeline_mode = #tpu.pipeline_mode<synchronous>, transform_indices = @transform_6, window_bounds = array<i64: 16, 128>}, {pipeline_mode = #tpu.pipeline_mode<synchronous>, transform_indices = @transform_7, window_bounds = array<i64: 1, 128>}, {transform_indices = @transform_8, window_bounds = array<i64: 1, 1, 128>}]} {
    %c0 = arith.constant 0 : index
    %c0_0 = arith.constant 0 : index
    %c0_1 = arith.constant 0 : index
    %0 = vector.load %arg1[%c0, %c0_0, %c0_1] : memref<1x256x36xbf16, #tpu.memory_space<vmem>>, vector<1x256x36xbf16>
    %1 = vector.shape_cast %0 : vector<1x256x36xbf16> to vector<256x36xbf16>
    %c0_2 = arith.constant 0 : index
    %c0_3 = arith.constant 0 : index
    %2 = vector.load %arg3[%c0_2, %c0_3] : memref<36x128xbf16, #tpu.memory_space<vmem>>, vector<36x128xbf16>
    %cst = arith.constant dense<0.000000e+00> : vector<256x128xf32>
    %3 = tpu.matmul %1, %2, %cst {dimension_numbers = #tpu.dot_dimension_numbers<[1], [0], [0], [1], [0, 0, 1, 1], [], []>} : vector<256x36xbf16>, vector<36x128xbf16>, vector<256x128xf32> -> vector<256x128xf32>
    %c0_4 = arith.constant 0 : index
    %c0_5 = arith.constant 0 : index
    %4 = vector.load %arg4[%c0_4, %c0_5] : memref<1x128xf32, #tpu.memory_space<vmem>>, vector<1x128xf32>
    %5 = vector.broadcast %4 : vector<1x128xf32> to vector<256x128xf32>
    %6 = arith.addf %3, %5 : vector<256x128xf32>
    %cst_6 = arith.constant 0.000000e+00 : f32
    %7 = vector.broadcast %cst_6 : f32 to vector<256x128xf32>
    %8 = arith.maximumf %6, %7 : vector<256x128xf32>
    %c0_7 = arith.constant 0 : index
    %c0_8 = arith.constant 0 : index
    %9 = vector.load %arg2[%c0_7, %c0_8] : memref<1x256xbf16, #tpu.memory_space<vmem>>, vector<1x256xbf16>
    %10 = arith.truncf %8 : vector<256x128xf32> to vector<256x128xbf16>
    %cst_9 = arith.constant dense<0.000000e+00> : vector<1x128xf32>
    %11 = tpu.matmul %9, %10, %cst_9 {dimension_numbers = #tpu.dot_dimension_numbers<[1], [0], [0], [1], [0, 0, 1, 1], [], []>} : vector<1x256xbf16>, vector<256x128xbf16>, vector<1x128xf32> -> vector<1x128xf32>
    %12 = arith.truncf %11 : vector<1x128xf32> to vector<1x128xbf16>
    %c0_10 = arith.constant 0 : index
    %c0_11 = arith.constant 0 : index
    %13 = vector.load %arg5[%c0_10, %c0_11] : memref<128x16xbf16, #tpu.memory_space<vmem>>, vector<128x16xbf16>
    %cst_12 = arith.constant dense<0.000000e+00> : vector<1x16xf32>
    %14 = tpu.matmul %12, %13, %cst_12 {dimension_numbers = #tpu.dot_dimension_numbers<[1], [0], [0], [1], [0, 0, 1, 1], [], []>} : vector<1x128xbf16>, vector<128x16xbf16>, vector<1x16xf32> -> vector<1x16xf32>
    %c0_13 = arith.constant 0 : index
    %c0_14 = arith.constant 0 : index
    %15 = vector.load %arg6[%c0_13, %c0_14] : memref<1x16xf32, #tpu.memory_space<vmem>>, vector<1x16xf32>
    %16 = arith.addf %14, %15 : vector<1x16xf32>
    %cst_15 = arith.constant 0.000000e+00 : f32
    %17 = vector.broadcast %cst_15 : f32 to vector<1x16xf32>
    %18 = arith.maximumf %16, %17 : vector<1x16xf32>
    %19 = arith.truncf %18 : vector<1x16xf32> to vector<1x16xbf16>
    %c0_16 = arith.constant 0 : index
    %c0_17 = arith.constant 0 : index
    %20 = vector.load %arg7[%c0_16, %c0_17] : memref<16x128xbf16, #tpu.memory_space<vmem>>, vector<16x128xbf16>
    %cst_18 = arith.constant dense<0.000000e+00> : vector<1x128xf32>
    %21 = tpu.matmul %19, %20, %cst_18 {dimension_numbers = #tpu.dot_dimension_numbers<[1], [0], [0], [1], [0, 0, 1, 1], [], []>} : vector<1x16xbf16>, vector<16x128xbf16>, vector<1x128xf32> -> vector<1x128xf32>
    %c0_19 = arith.constant 0 : index
    %c0_20 = arith.constant 0 : index
    %22 = vector.load %arg8[%c0_19, %c0_20] : memref<1x128xf32, #tpu.memory_space<vmem>>, vector<1x128xf32>
    %23 = arith.addf %21, %22 : vector<1x128xf32>
    %c0_21 = arith.constant 0 : index
    %c0_22 = arith.constant 0 : index
    %c0_23 = arith.constant 0 : index
    %24 = vector.load %arg9[%c0_21, %c0_22, %c0_23] : memref<1x1x128xf32, #tpu.memory_space<vmem>>, vector<1x1x128xf32>
    %25 = vector.shape_cast %24 : vector<1x1x128xf32> to vector<1x128xf32>
    %26 = vector.shape_cast %23 : vector<1x128xf32> to vector<1x1x128xf32>
    tpu.vector_store %arg9[%c0_21, %c0_22, %c0_23], %26 {strides = array<i32>} : memref<1x1x128xf32, #tpu.memory_space<vmem>>, vector<1x1x128xf32>,
    return
  }
  func.func @transform_0(%arg0: i32) -> (i32, i32, i32) {
    %c0_i32 = arith.constant 0 : i32
    %c0_i32_0 = arith.constant 0 : i32
    %c0_i32_1 = arith.constant 0 : i32
    return %arg0, %c0_i32, %c0_i32_0 : i32, i32, i32
  }
  func.func @transform_1(%arg0: i32) -> (i32, i32) {
    %c0_i32 = arith.constant 0 : i32
    %c0_i32_0 = arith.constant 0 : i32
    %c0_i32_1 = arith.constant 0 : i32
    return %c0_i32, %c0_i32_0 : i32, i32
  }
  func.func @transform_2(%arg0: i32) -> (i32, i32) {
    %c0_i32 = arith.constant 0 : i32
    %c0_i32_0 = arith.constant 0 : i32
    %c0_i32_1 = arith.constant 0 : i32
    return %c0_i32, %c0_i32_0 : i32, i32
  }
  func.func @transform_3(%arg0: i32) -> (i32, i32) {
    %c0_i32 = arith.constant 0 : i32
    %c0_i32_0 = arith.constant 0 : i32
    %c0_i32_1 = arith.constant 0 : i32
    return %c0_i32, %c0_i32_0 : i32, i32
  }
  func.func @transform_4(%arg0: i32) -> (i32, i32) {
    %c0_i32 = arith.constant 0 : i32
    %c0_i32_0 = arith.constant 0 : i32
    %c0_i32_1 = arith.constant 0 : i32
    return %c0_i32, %c0_i32_0 : i32, i32
  }
  func.func @transform_5(%arg0: i32) -> (i32, i32) {
    %c0_i32 = arith.constant 0 : i32
    %c0_i32_0 = arith.constant 0 : i32
    %c0_i32_1 = arith.constant 0 : i32
    return %c0_i32, %c0_i32_0 : i32, i32
  }
  func.func @transform_6(%arg0: i32) -> (i32, i32) {
    %c0_i32 = arith.constant 0 : i32
    %c0_i32_0 = arith.constant 0 : i32
    %c0_i32_1 = arith.constant 0 : i32
    return %c0_i32, %c0_i32_0 : i32, i32
  }
  func.func @transform_7(%arg0: i32) -> (i32, i32) {
    %c0_i32 = arith.constant 0 : i32
    %c0_i32_0 = arith.constant 0 : i32
    %c0_i32_1 = arith.constant 0 : i32
    return %c0_i32, %c0_i32_0 : i32, i32
  }
  func.func @transform_8(%arg0: i32) -> (i32, i32, i32) {
    %c0_i32 = arith.constant 0 : i32
    %c0_i32_0 = arith.constant 0 : i32
    %c0_i32_1 = arith.constant 0 : i32
    return %arg0, %c0_i32, %c0_i32_0 : i32, i32, i32
  }
}

</mosaic_0001>

<bundles_post_ra>
// kernel: enhanced_devise_cnn.1
= control target key start
LH: loop header
LB: loop body
LE: loop exit
PB: predicated region body
PF: predicated region fallthrough
CT: control target
= control target key end

     0   :  { %13 = vsyncpa [#allocation3], 0  ;;  %s1377_s0 = inlined_call_operand.vmem [shape: bf16[2,256,36], index: 0, kind: input, shape index: {}]   ;;  %s1378_s1 = inlined_call_operand.vmem [shape: bf16[1,256], index: 1, kind: input, shape index: {}]   ;;  %s1379_s2 = inlined_call_operand.vmem [shape: bf16[36,128], index: 2, kind: input, shape index: {}]   ;;  %s1380_s3 = inlined_call_operand.vmem [shape: f32[1,128], index: 3, kind: input, shape index: {}]   ;;  %s1381_s4 = inlined_call_operand.vmem [shape: bf16[128,16], index: 4, kind: input, shape index: {}]   ;;  %s1382_s5 = inlined_call_operand.vmem [shape: f32[1,16], index: 5, kind: input, shape index: {}]   ;;  %s1383_s6 = inlined_call_operand.vmem [shape: bf16[16,128], index: 6, kind: input, shape index: {}]   ;;  %s1384_s7 = inlined_call_operand.vmem [shape: f32[1,128], index: 7, kind: input, shape index: {}]   ;;  %s1385_s8 = inlined_call_operand.hbm [shape: f32[2,1,128], index: 8, kind: output, shape index: {}]  }
   0x1   :  { %15 = vsyncpa [#allocation3 + $0x1], 0  ;;  %s1155_s27 = smov 0   ;;  %s1157_s28 = smov 0  }
   0x2   :  { %s1159_s29 = smov 0   ;;  %s1161_s30 = smov 0  }
   0x3 LB: > { %s1176_s9 = sadd.s32 4294967295, %s1108_s30   ;;  %s839_s10 = sadd.s32 4294967294, %s1108_s30   ;;  %s1108_s30 = sphi %s1161_s30, %s1391_s30   ;;  %s1104_s29 = sphi %s1159_s29, %s1390_s29   ;;  %s1100_s28 = sphi %s1157_s28, %s1389_s28   ;;  %s1096_s27 = sphi %s1155_s27, %s1388_s27  }
   0x4   : > { %s1180_s11 = sadd.s32 1, %s1108_s30   ;;  %s201_s12 = sadd.s32 1, %s1104_s29 }
   0x5   : > { %s198_s13 = ssub.s32 %s1108_s30, %s1180_s11  ;;  %p211_p0 = scmp.ne.s32.totalorder %s1104_s29, %s1100_s28 }
   0x6   : > { %p199_p1 = scmp.eq.s32.totalorder %s198_s13, 0  ;;  %p212_p2 = scmp.eq.s32.totalorder %s1176_s9, 1 }
   0x7   : > { %p217_p3 = scmp.ne.s32.totalorder %s1100_s28, %s1096_s27  ;;  %p218_p4 = scmp.eq.s32.totalorder %s839_s10, 1 }
   0x8   : > { %s1191_s14 = scalar_select %p199_p1, %s1104_s29, %s201_s12  }
   0x9   : > { %p1193_p5 = por %p212_p2, %p211_p0  ;;  %p1197_p6 = por %p218_p4, %p217_p3 }
   0xa   : > { %p842_p7 = scmp.ge.s32.totalorder %s1108_s30, 1  ;;  %p265_p8 = scmp.lt.s32.totalorder %s1108_s30, 3 }
   0xc   : > { %p266_p9 = pnand %p842_p7, %p265_p8 }
   0xd   : > { %p298_p10 = scmp.lt.s32.totalorder (!%p266_p9), %s1176_s9, 1  ;;  %s296_s26 = sand.u32 (!%p266_p9), 1, %s1100_s28  }
   0xe   : > { %269 = sbr.rel (%p266_p9) target bundleno = 685 (0x2ad), region = 52  ;;  %s780_s13 = scalar_lea.hbm (!%p266_p9), %s1385_s8, %s1176_s9 }
   0xf   : > { %s784_s21 = sshll.u32 (!%p266_p9), %s780_s13, 4  ;;  %s785_s21 = int_to_ptr.hbm [resolvable:$true] %s784_s21 }
  0x10   : > { %s1060_s23 = sshra.s32 (!%p266_p9), %s785_s21, 4  ;;  %s1061_s23 = int_to_ptr.hbm [resolvable:$true] %s1060_s23 }
  0x11   : > { %s1062_s24 = scalar_lea.hbm (!%p266_p9), %s1061_s23, 1  ;;  %p1067_p0 = scmp.lt.s32.totalorder (!%p266_p9), %s1061_s23, %s1385_s8 }
  0x12   : > { %p1063_p11 = scmp.ne.s32.totalorder (!%p266_p9), %s1061_s23, %s1062_s24 }
  0x13   : > { %v340_v0 = vld [vmem:[%s1379_s2 + $0x10] sm:$0x3]  ;;  %vm489_vm0 = vcmask 1041408   ;;  %s299_s19 = scalar_select %p298_p10, %s1176_s9, 1  ;;  %v990_v4 = vld [vmem:[%s1379_s2 + $0x8] sm:$0xff]  ;;  %v989_v5 = vld [vmem:[%s1379_s2] sm:$0xff] }
  0x14   : > { %v434_v1 = vunpack.c.l.b16 %v340_v0  ;;  %vm440_vm1 = vcmask 293888   ;;  %v1254_v23 = vld [vmem:[%s1380_s3] ss:$0 sm:$0xff]  ;;  %vm753_vm2 = vcmask 130048   ;;  %p1064_p12 = pnand %p1063_p11, %p1193_p5 }
  0x15   : > { %s972_s22 = sshll.u32 %s299_s19, 7  ;;  %s297_s19 = scalar_lea.vmem [#allocation2], %s296_s26 }
  0x16   : > { %v437_v2 = vpack.c.b16 %v434_v1, %v434_v1  ;;  %s1217_s10 = scalar_lea.vmem %s1377_s0, %s972_s22  ;;  %s782_s20 = sshll.u32 %s297_s19, 4  ;;  %s783_s20 = int_to_ptr.vmem [resolvable:$true] %s782_s20 }
  0x17   : > { %v973_v6 = vld [vmem:[%s1217_s10] sm:$0xff]  ;;  %v984_v7 = vld [vmem:[%s1217_s10 + $0x58] sm:$0xff]  ;;  %v979_v8 = vld [vmem:[%s1217_s10 + $0x30] sm:$0xff]  ;;  %s772_s22 = scalar_lea.sflag [#allocation3], %s296_s26  ;;  %p1065_p13 = pneg %p1064_p12 }
  0x18   : > { %v491_v3 = vsel %vm489_vm0, %v437_v2, 0  ;;  %v974_v9 = vld [vmem:[%s1217_s10 + $0x8] sm:$0xff]  ;;  %v985_v10 = vld [vmem:[%s1217_s10 + $0x60] sm:$0xff]  ;;  %v980_v11 = vld [vmem:[%s1217_s10 + $0x38] sm:$0xff] }
  0x19   : > { %498 = vmatpush.bf16.msra.mxu0 %v491_v3  ;;  %1001 = vmatpush.bf16.msra.mxu3 %v491_v3  ;;  %v975_v12 = vld [vmem:[%s1217_s10 + $0x10] sm:$0xff]  ;;  %v986_v13 = vld [vmem:[%s1217_s10 + $0x68] sm:$0xff]  ;;  %v981_v14 = vld [vmem:[%s1217_s10 + $0x40] sm:$0xff] }
  0x1a   : > { %1000 = vmatpush.bf16.msra.mxu2 %v491_v3  ;;  %v976_v15 = vld [vmem:[%s1217_s10 + $0x18] sm:$0xff]  ;;  %v987_v16 = vld [vmem:[%s1217_s10 + $0x70] sm:$0xff]  ;;  %v982_v17 = vld [vmem:[%s1217_s10 + $0x48] sm:$0xff] }
  0x1b   : > { %v977_v18 = vld [vmem:[%s1217_s10 + $0x20] sm:$0xff]  ;;  %v988_v19 = vld [vmem:[%s1217_s10 + $0x78] sm:$0xff]  ;;  %v983_v20 = vld [vmem:[%s1217_s10 + $0x50] sm:$0xff] }
  0x1c   : > { %v978_v21 = vld [vmem:[%s1217_s10 + $0x28] sm:$0xff]  ;;  %s1066_s10 = scalar_lea.hbm %s1385_s8, 2 }
  0x1d   : > { %499 = vmatpush.bf16.msra.mxu0 %v990_v4  ;;  %1003 = vmatpush.bf16.msra.mxu3 %v990_v4  ;;  %p1068_p1 = scmp.lt.s32.totalorder %s1066_s10, %s1062_s24 }
  0x1e   : > { %1002 = vmatpush.bf16.msra.mxu2 %v990_v4 }
  0x1f   : > { %p1069_p2 = por %p1068_p1, %p1067_p0 }
  0x21   : > { %500 = vmatpush.bf16.msra.mxu0 %v989_v5  ;;  %1005 = vmatpush.bf16.msra.mxu3 %v989_v5  ;;  %p1070_p3 = pnand %p1069_p2, %p1065_p13 }
  0x22   : > { %1004 = vmatpush.bf16.msra.mxu2 %v989_v5 }
  0x24   : > { %917 = vmatmul.msk.bf16.vlgmr.msra.gmra.mxu0 %vm440_vm1, %v973_v6  ;;  %928 = vmatmul.msk.bf16.vlgmr.msra.gmra.mxu3 %vm440_vm1, %v984_v7 }
  0x25   : > { %923 = vmatmul.msk.bf16.vlgmr.msra.gmra.mxu2 %vm440_vm1, %v979_v8 }
  0x34   : > { %918 = vmatmul.msk.bf16.gmra.mxu0 %vm440_vm1, %v974_v9  ;;  %929 = vmatmul.msk.bf16.gmra.mxu3 %vm440_vm1, %v985_v10 }
  0x35   : > { %924 = vmatmul.msk.bf16.gmra.mxu2 %vm440_vm1, %v980_v11  ;;  %v614_v11 = vld [vmem:[%s1378_s1] sm:$0x3] }
  0x36   : > { %632 = vst [vmem:[#allocation1] ss:$9 sm:$0xff] %v614_v11 }
  0x44   : > { %919 = vmatmul.msk.bf16.gmra.mxu0 %vm440_vm1, %v975_v12  ;;  %930 = vmatmul.msk.bf16.gmra.mxu3 %vm440_vm1, %v986_v13 }
  0x45   : > { %925 = vmatmul.msk.bf16.gmra.mxu2 %vm440_vm1, %v981_v14 }
  0x54   : > { %920 = vmatmul.msk.bf16.gmra.mxu0 %vm440_vm1, %v976_v15  ;;  %931 = vmatmul.msk.bf16.gmra.mxu3 %vm440_vm1, %v987_v16 }
  0x55   : > { %926 = vmatmul.msk.bf16.gmra.mxu2 %vm440_vm1, %v982_v17 }
  0x64   : > { %921 = vmatmul.msk.bf16.gmra.mxu0 %vm440_vm1, %v977_v18  ;;  %932 = vmatmul.msk.bf16.gmra.mxu3 %vm440_vm1, %v988_v19 }
  0x65   : > { %927 = vmatmul.msk.bf16.gmra.mxu2 %vm440_vm1, %v983_v20 }
  0x74   : > { %922 = vmatmul.msk.bf16.gmra.mxu0 %vm440_vm1, %v978_v21 }
  0xa1   : > { %v502_v22 = vpop.f32.mrf.mxu0 }
  0xa2   : > { %v503_v25 = vadd.f32 %v1254_v23, %v502_v22 }
  0xa4   : > { %v582_v29 = vmax.f32 %v503_v25, 0.0 }
  0xa7   : > { %v557_v24 = vpop.f32.mrf.mxu3 }
  0xa8   : > { %v532_v26 = vpop.f32.mrf.mxu2  ;;  %v558_v31 = vadd.f32 %v1254_v23, %v557_v24 }
  0xa9   : > { %v504_v27 = vpop.f32.mrf.mxu0  ;;  %v533_v51 = vadd.f32 %v1254_v23, %v532_v26 }
  0xaa   : > { %v505_v28 = vadd.f32 %v1254_v23, %v504_v27  ;;  %v604_v37 = vmax.f32 %v558_v31, 0.0 }
  0xab   : > { %v594_v57 = vmax.f32 %v533_v51, 0.0 }
  0xac   : > { %v583_v30 = vmax.f32 %v505_v28, 0.0  ;;  %v998_v28 = vld [vmem:[%s1381_s4 + $0x38] sm:$0xff] }
  0xad   : > { %729 = vmatpush.bf16.msrb.mxu3 %v998_v28 }
  0xae   : > { %v1259_v32 = vpack.c.bf16 %v583_v30, %v582_v29 }
  0xaf   : > { %v559_v33 = vpop.f32.mrf.mxu3 }
  0xb0   : > { %v560_v34 = vadd.f32 %v1254_v23, %v559_v33  ;;  %v534_v35 = vpop.f32.mrf.mxu2 }
  0xb1   : > { %v507_v36 = vpop.f32.mrf.mxu0  ;;  %v535_v53 = vadd.f32 %v1254_v23, %v534_v35 }
  0xb2   : > { %v605_v38 = vmax.f32 %v560_v34, 0.0  ;;  %v508_v41 = vadd.f32 %v1254_v23, %v507_v36  ;;  %v997_v34 = vld [vmem:[%s1381_s4 + $0x30] sm:$0xff] }
  0xb3   : > { %v595_v58 = vmax.f32 %v535_v53, 0.0  ;;  %730 = vmatpush.bf16.msrb.mxu3 %v997_v34 }
  0xb4   : > { %v1262_v39 = vpack.c.bf16 %v605_v38, %v604_v37  ;;  %v584_v45 = vmax.f32 %v508_v41, 0.0 }
  0xb5   : > { %v621_v62 = vpack.c.bf16 %v595_v58, %v594_v57  ;;  %v995_v58 = vld [vmem:[%s1381_s4 + $0x20] sm:$0xff] }
  0xb7   : > { %v562_v40 = vpop.f32.mrf.mxu3 }
  0xb8   : > { %v537_v42 = vpop.f32.mrf.mxu2  ;;  %v563_v35 = vadd.f32 %v1254_v23, %v562_v40 }
  0xb9   : > { %v509_v43 = vpop.f32.mrf.mxu0  ;;  %v538_v47 = vadd.f32 %v1254_v23, %v537_v42 }
  0xba   : > { %v510_v44 = vadd.f32 %v1254_v23, %v509_v43 }
  0xbb   : > { %v596_v54 = vmax.f32 %v538_v47, 0.0  ;;  %v996_v47 = vld [vmem:[%s1381_s4 + $0x28] sm:$0xff] }
  0xbc   : > { %v585_v46 = vmax.f32 %v510_v44, 0.0  ;;  %731 = vmatpush.bf16.msrb.mxu3 %v996_v47 }
  0xbe   : > { %v1267_v48 = vpack.c.bf16 %v585_v46, %v584_v45 }
  0xbf   : > { %v564_v49 = vpop.f32.mrf.mxu3 }
  0xc0   : > { %v539_v50 = vpop.f32.mrf.mxu2  ;;  %v565_v27 = vadd.f32 %v1254_v23, %v564_v49  ;;  %v606_v49 = vmax.f32 %v563_v35, 0.0  ;;  %732 = vmatpush.bf16.msrb.mxu3 %v995_v58 }
  0xc1   : > { %v1270_v52 = vpop.f32.mrf.mxu0  ;;  %v540_v55 = vadd.f32 %v1254_v23, %v539_v50 }
  0xc2   : > { %v607_v41 = vmax.f32 %v565_v27, 0.0 }
  0xc3   : > { %v597_v56 = vmax.f32 %v540_v55, 0.0 }
  0xc5   : > { %v622_v59 = vpack.c.bf16 %v597_v56, %v596_v54  ;;  %v627_v56 = vpack.c.bf16 %v607_v41, %v606_v49 }
  0xc7   : > { %v567_v60 = vpop.f32.mrf.mxu3  ;;  %637 = vmatpush.bf16.msra.mxu1 %v622_v59 }
  0xc8   : > { %v1276_v63 = vpop.f32.mrf.mxu2  ;;  %v568_v25 = vadd.f32 %v1254_v23, %v567_v60 }
  0xc9   : > { %v1274_v61 = vpop.f32.mrf.mxu0 }
  0xca   : > { %v608_v36 = vmax.f32 %v568_v25, 0.0  ;;  %v515_v59 = vadd.f32 %v1254_v23, %v1274_v61 }
  0xcb   : > { %638 = vmatpush.bf16.msra.mxu1 %v621_v62 }
  0xcc   : > { %v587_v61 = vmax.f32 %v515_v59, 0.0 }
  0xcf   : > { %v569_v0 = vpop.f32.mrf.mxu3 }
  0xd0   : > { %v1278_v2 = vpop.f32.mrf.mxu2  ;;  %v570_v21 = vadd.f32 %v1254_v23, %v569_v0  ;;  %v513_v0 = vadd.f32 %v1254_v23, %v1270_v52  ;;  %v543_v52 = vadd.f32 %v1254_v23, %v1276_v63 }
  0xd1   : > { %v517_v1 = vpop.f32.mrf.mxu0 }
  0xd2   : > { %v609_v29 = vmax.f32 %v570_v21, 0.0  ;;  %v518_v53 = vadd.f32 %v1254_v23, %v517_v1  ;;  %v586_v11 = vmax.f32 %v513_v0, 0.0 }
  0xd4   : > { %v628_v45 = vpack.c.bf16 %v609_v29, %v608_v36  ;;  %v588_v1 = vmax.f32 %v518_v53, 0.0 }
  0xd7   : > { %v572_v3 = vpop.f32.mrf.mxu3 }
  0xd8   : > { %v547_v6 = vpop.f32.mrf.mxu2  ;;  %v573_v17 = vadd.f32 %v1254_v23, %v572_v3 }
  0xd9   : > { %v519_v4 = vpop.f32.mrf.mxu0  ;;  %v548_v3 = vadd.f32 %v1254_v23, %v547_v6  ;;  %v545_v6 = vadd.f32 %v1254_v23, %v1278_v2  ;;  %v634_v2 = vld [vmem:[#allocation1 + $0x9] sm:$0xff] }
  0xda   : > { %v610_v26 = vmax.f32 %v573_v17, 0.0  ;;  %v520_v40 = vadd.f32 %v1254_v23, %v519_v4 }
  0xdc   : > { %v589_v60 = vmax.f32 %v520_v40, 0.0 }
  0xdf   : > { %v574_v5 = vpop.f32.mrf.mxu3 }
  0xe0   : > { %v549_v10 = vpop.f32.mrf.mxu2  ;;  %v575_v14 = vadd.f32 %v1254_v23, %v574_v5 }
  0xe1   : > { %v522_v7 = vpop.f32.mrf.mxu0  ;;  %v550_v4 = vadd.f32 %v1254_v23, %v549_v10  ;;  %v600_v10 = vmax.f32 %v548_v3, 0.0 }
  0xe2   : > { %v611_v22 = vmax.f32 %v575_v14, 0.0  ;;  %v523_v42 = vadd.f32 %v1254_v23, %v522_v7  ;;  %v993_v14 = vld [vmem:[%s1381_s4 + $0x10] sm:$0xff] }
  0xe4   : > { %v629_v31 = vpack.c.bf16 %v611_v22, %v610_v26  ;;  %v590_v54 = vmax.f32 %v523_v42, 0.0  ;;  %v680_v26 = vld [vmem:[%s1382_s5] sm:$0x1] }
  0xe7   : > { %v577_v8 = vpop.f32.mrf.mxu3 }
  0xe8   : > { %v578_v12 = vadd.f32 %v1254_v23, %v577_v8  ;;  %v552_v20 = vpop.f32.mrf.mxu2  ;;  %v994_v8 = vld [vmem:[%s1381_s4 + $0x18] sm:$0xff] }
  0xe9   : > { %v524_v9 = vpop.f32.mrf.mxu0  ;;  %v553_v55 = vadd.f32 %v1254_v23, %v552_v20  ;;  %733 = vmatpush.bf16.msrb.mxu3 %v994_v8  ;;  %v999_v20 = vld [vmem:[%s1383_s6] sm:$0xff] }
  0xea   : > { %v612_v18 = vmax.f32 %v578_v12, 0.0  ;;  %v525_v37 = vadd.f32 %v1254_v23, %v524_v9  ;;  %v618_v9 = vpack.c.bf16 %v589_v60, %v588_v1  ;;  %v601_v12 = vmax.f32 %v550_v4, 0.0 }
  0xeb   : > { %v602_v5 = vmax.f32 %v553_v55, 0.0 }
  0xec   : > { %v591_v50 = vmax.f32 %v525_v37, 0.0  ;;  %v624_v17 = vpack.c.bf16 %v601_v12, %v600_v10 }
  0xed   : > { %734 = vmatpush.bf16.msrb.mxu3 %v993_v14 }
  0xee   : > { %v619_v62 = vpack.c.bf16 %v591_v50, %v590_v54 }
  0xef   : > { %v579_v13 = vpop.f32.mrf.mxu3 }
  0xf0   : > { %v580_v15 = vadd.f32 %v1254_v23, %v579_v13  ;;  %v554_v46 = vpop.f32.mrf.mxu2 }
  0xf1   : > { %v527_v16 = vpop.f32.mrf.mxu0  ;;  %v555_v57 = vadd.f32 %v1254_v23, %v554_v46 }
  0xf2   : > { %v613_v19 = vmax.f32 %v580_v15, 0.0  ;;  %v528_v30 = vadd.f32 %v1254_v23, %v527_v16  ;;  %v617_v15 = vpack.c.bf16 %v587_v61, %v586_v11  ;;  %v599_v16 = vmax.f32 %v545_v6, 0.0 }
  0xf3   : > { %v603_v7 = vmax.f32 %v555_v57, 0.0 }
  0xf4   : > { %v630_v24 = vpack.c.bf16 %v613_v19, %v612_v18  ;;  %v592_v43 = vmax.f32 %v528_v30, 0.0  ;;  %v633_v18 = vld [vmem:[#allocation1] sm:$0xff] }
  0xf5   : > { %v625_v13 = vpack.c.bf16 %v603_v7, %v602_v5  ;;  %v991_v19 = vld [vmem:[%s1381_s4] sm:$0xff] }
  0xf6   : > { %650 = vmatpush.bf16.msrb.mxu2 %v630_v24 }
  0xf9   : > { %v529_v33 = vpop.f32.mrf.mxu0 }
  0xfa   : > { %v530_v38 = vadd.f32 %v1254_v23, %v529_v33  ;;  %651 = vmatpush.bf16.msrb.mxu2 %v629_v31  ;;  %v992_v23 = vld [vmem:[%s1381_s4 + $0x8] sm:$0xff]  ;;  %v746_v33 = vld [vmem:[%s1384_s7] sm:$0x1] }
  0xfb   : > { %735 = vmatpush.bf16.msrb.mxu3 %v992_v23 }
  0xfc   : > { %v593_v44 = vmax.f32 %v530_v38, 0.0 }
  0xfe   : > { %652 = vmatpush.bf16.msrb.mxu2 %v628_v45  ;;  %v620_v51 = vpack.c.bf16 %v593_v44, %v592_v43 }
  0xff   : > { %736 = vmatpush.bf16.msrb.mxu3 %v991_v19 }
 0x100   : > { %639 = vmatpush.bf16.msra.mxu1 %v620_v51 }
 0x102   : > { %653 = vmatpush.bf16.msrb.mxu2 %v627_v56 }
 0x104   : > { %640 = vmatpush.bf16.msra.mxu1 %v619_v62 }
 0x106   : > { %654 = vmatpush.bf16.msrb.mxu2 %v1262_v39  ;;  %v598_v39 = vmax.f32 %v543_v52, 0.0 }
 0x108   : > { %641 = vmatpush.bf16.msra.mxu1 %v618_v9  ;;  %v623_v63 = vpack.c.bf16 %v599_v16, %v598_v39 }
 0x10a   : > { %655 = vmatpush.bf16.msrb.mxu2 %v625_v13 }
 0x10c   : > { %642 = vmatpush.bf16.msra.mxu1 %v617_v15 }
 0x10e   : > { %656 = vmatpush.bf16.msrb.mxu2 %v624_v17 }
 0x110   : > { %643 = vmatpush.bf16.msra.mxu1 %v1267_v48 }
 0x112   : > { %657 = vmatpush.bf16.msrb.mxu2 %v623_v63 }
 0x114   : > { %644 = vmatpush.bf16.msra.mxu1 %v1259_v32 }
 0x115   : > { %658 = vmatmul.bf16.vlgmr.msrb.gmra.mxu2 %v634_v2 }
 0x117   : > { %645 = vmatmul.bf16.vlgmr.msra.gmra.mxu1 %v633_v18 }
 0x118   : > { %764 = vmatpush.bf16.msrb.mxu1 %v999_v20 }
 0x194   : > { %v646_v48 = vpop.f32.mrf.mxu1 }
 0x198   : > { %v659_v21 = vpop.f32.mrf.mxu2 }
 0x199   : > { %v660_v22 = vadd.f32 %v659_v21, %v646_v48 }
 0x19b   : > { %v663_v24 = vpack.c.bf16 %v660_v22, %v660_v22 }
 0x19c   : > { %v648_v32 = vpop.f32.mrf.mxu1 }
 0x19d   : > { %737 = vmatmul.bf16.vlgmr.msrb.gmra.mxu3 %v663_v24 }
 0x1a0   : > { %v661_v25 = vpop.f32.mrf.mxu2 }
 0x220   : > { %v738_v27 = vpop.f32.mrf.mxu3 }
 0x221   : > { %v739_v28 = vadd.f32 %v738_v27, %v680_v26 }
 0x223   : > { %v742_v29 = vmax.f32 %v739_v28, 0.0 }
 0x225   : > { %v743_v30 = vpack.c.bf16 %v742_v29, %v742_v29 }
 0x227   : > { %969 = vmatmul.msk.bf16.vlgmr.msrb.gmra.mxu1 %vm753_vm2, %v743_v30 }
 0x228   : > { %v740_v31 = vpop.f32.mrf.mxu3 }
 0x2a4   : > { %v766_v34 = vpop.f32.mrf.mxu1 }
 0x2a5   : > { %v767_v35 = vadd.f32 %v766_v34, %v746_v33 }
 0x2a7   : > { %770 = vst [vmem:[%s297_s19] sm:$0x1] %v767_v35 }
 0x2a8   : > { %1073 = shalt.err (!%p1070_p3)
}
 0x2a9   : > { %1006 = dma.vmem_to_hbm [thread:$0]  (%p1193_p5), %s783_s20, 16, %s785_s21, %s772_s22  }
 0x2ac   : > { %v768_v36 = vpop.f32.mrf.mxu1 }
 0x2ad PF: > { %p1012_p4 = scmp.ge.s32.totalorder %s1108_s30, 2  ;;  %s796_s26 = sand.u32 1, %s1096_s27  }
 0x2ae   : > { %s797_s13 = scalar_lea.sflag [#allocation3], %s796_s26 }
 0x2af   : > { %p1009_p7 = pnand %p1012_p4, %p1197_p6 }
 0x2b1   : > { %p1010_p8 = pneg %p1009_p7 }
 0x2b3   : > { %1091 = dma.done.wait (%p1010_p8), %s797_s13, 16  }
 0x2b4   : > { %1093 = vsyncadd (%p1010_p8), %s797_s13, 4294967280  ;;  %p18_p9 = scmp.ge.s32.totalorder %s1180_s11, 4   ;;  %s1388_s27 = smov %s1100_s28 }
 0x2b5   : > { %s1389_s28 = smov %s1104_s29  ;;  %s1390_s29 = smov %s1191_s14 }
 0x2b6   : > { %s1391_s30 = smov %s1180_s11  ;;  %20 = sbr.rel (!%p18_p9) target bundleno = 3 (0x3), region = 87 }
 0x2bb   :  { %802 = vsyncpa [#allocation3], 1 }
 0x2bc   :  { %804 = vsyncpa [#allocation3 + $0x1], 1 }

</bundles_post_ra>
